<compile_context>
chip_gen: v5e
topology: v5e:2x2
jax: 0.10.0
libtpu: 0.0.40
codegen_flags: <defaults>
</compile_context>

<pallas_src>
import math

import jax
import jax.numpy as jnp
from jax.experimental import pallas as pl
from jax.experimental.pallas import tpu as pltpu

# ----- small config, consistent with PointPatchV4FeatNet defaults (scaled down) -----
B = 2              # batch
N = 128            # dim_in[0] (number of points)
D = 3              # dim_in[1] (xyz)
PATCH = 16         # patch_size
S = N // PATCH     # number of patches (group ratio 1.0) = 8
K = 8              # knn
HID = 32           # hidden
TOK = 64           # token_size
D_OUT = 128        # dim_out
NP = B * S * PATCH  # total points across the batch = 256 (rides the 128-lane axis)
SCALE = 1.0 / math.sqrt(TOK)

# ----- packed slab layout (rows x 128 lanes, f32): weights + per-call centers -----
R_W1 = 0      # rows [0,32):    cols 0:6 = w1^T (HID, 2D), col 6 = b1 (HID,)
R_W2 = 32     # rows [32,64):   cols 0:TOK = w2 (HID, TOK)
R_VEC = 64    # rows [64,72):   row 64=b2(TOK) 65=bp1(HID) 66=bp2(TOK) 67=bo(D_OUT) 68=qk(TOK)
R_WP1 = 72    # rows [72,80):   rows 72:75, cols 0:HID = wp1 (3, HID)
R_WP2 = 80    # rows [80,112):  cols 0:TOK = wp2 (HID, TOK)
R_WVO = 112   # rows [112,176): cols 0:D_OUT = wv @ wo (TOK, D_OUT)
R_C = 176     # rows [176,192): cols 0:3 = patch centers (B*S, 3)  [per-call data]
R_TOT = 192
LANES = 128


# ---------------------------------------------------------------------------
# Pallas kernel: patch encoder + pos-embed + patch-wise attention, full batch.
# ---------------------------------------------------------------------------
def _featnet_kernel(e_ref, w_ref, o_ref):
    f32 = jnp.float32

    # --- KNNPatchEncoder stage 1: edge-conv (2D -> HID) on the MXU, running max over K ---
    # feature-major, lane-dense: activations are (HID, NP) with NP=256 on lanes.
    w1T = w_ref[R_W1:R_W1 + HID, :2 * D]                           # (HID, 2D)
    f = jnp.dot(w1T, e_ref[0], preferred_element_type=f32)         # (HID, NP), MXU
    for k in range(1, K):                                          # static unroll, K = 8
        h = jnp.dot(w1T, e_ref[k], preferred_element_type=f32)
        f = jnp.maximum(f, h)                                      # running max over K (VPU)
    b1 = w_ref[R_W1:R_W1 + HID, 2 * D:2 * D + 1]                   # (HID, 1)
    f = jnp.maximum(f + b1, 0.0)   # max_k relu(We+b) == relu(max_k(We)+b): bias+ReLU once

    # --- stage 2: point MLP (HID -> TOK), max over the PATCH points of every patch ---
    w2 = w_ref[R_W2:R_W2 + HID, :TOK]                              # (HID, TOK)
    b2 = w_ref[R_VEC + 0:R_VEC + 1, :TOK]                          # (1, TOK)
    # f.T is a tiny (32,256)->(256,32) transpose (XLU path), not a materialized lane-sparse copy
    # of a large value; the matmul contracts over HID on the MXU.
    h2 = jnp.dot(f.T, w2, preferred_element_type=f32) + b2         # (NP, TOK)
    # rows ordered np = p*(B*S) + b*S + s -> each PATCH slab is an aligned 16-row slice
    z = h2[0:B * S, :]
    for p_ in range(1, PATCH):                                     # elementwise running max
        z = jnp.maximum(z, h2[p_ * (B * S):(p_ + 1) * (B * S), :])  # (B*S, TOK) patch tokens

    # --- pos_embed ('mlp'): Linear(3->HID) -> GELU -> Linear(HID->TOK) on patch centers ---
    wp1 = w_ref[R_WP1:R_WP1 + D, :HID]                             # (3, HID)
    bp1 = w_ref[R_VEC + 1:R_VEC + 2, :HID]                         # (1, HID)
    wp2 = w_ref[R_WP2:R_WP2 + HID, :TOK]                           # (HID, TOK)
    bp2 = w_ref[R_VEC + 2:R_VEC + 3, :TOK]                         # (1, TOK)
    c = w_ref[R_C:R_C + B * S, :D]                                 # (B*S, 3) centers from slab
    ph = jnp.dot(c, wp1, preferred_element_type=f32) + bp1
    ph = jax.nn.gelu(ph)   # TODO(synk): tanh-approx GELU; torch nn.GELU default is exact erf
    pe = jnp.dot(ph, wp2, preferred_element_type=f32) + bp2
    z = z + pe                                                     # (B*S, TOK)

    # --- PatchWiseAttentionFeatNet (folded): logits = z@(wk q); out = (attn^T z)(wv wo) + bo ---
    qk = w_ref[R_VEC + 4:R_VEC + 5, :TOK]                          # (1, TOK)
    logits = jnp.sum(z * qk, axis=-1, keepdims=True) * SCALE       # (B*S, 1)
    lg = logits.reshape(B, S, 1)                                   # sublane-group aligned split
    m = jnp.max(lg, axis=1, keepdims=True)
    wts = jnp.exp(lg - m)
    attn = wts / jnp.sum(wts, axis=1, keepdims=True)               # (B, S, 1) softmax over patches
    zb = z.reshape(B, S, TOK)
    pooled = jnp.sum(attn * zb, axis=1)                            # (B, TOK)

    wvo = w_ref[R_WVO:R_WVO + TOK, :D_OUT]                         # (TOK, D_OUT) = wv @ wo
    bo = w_ref[R_VEC + 3:R_VEC + 4, :D_OUT]                        # (1, D_OUT)
    # single lane-dense (B, D_OUT) store
    o_ref[...] = jnp.dot(pooled, wvo, preferred_element_type=f32) + bo


# ---------------------------------------------------------------------------
# Plain-JAX glue: FPS grouping + in-patch kNN edge-feature construction
# (the torch module runs grouping under torch.no_grad()).
# ---------------------------------------------------------------------------
def _fps(x, n):
    """Farthest point sampling. x: (B, N, 3) -> indices (B, n)."""
    # TODO(synk): seeds at index 0; torch FPS implementations may seed differently.
    def per_cloud(pts):
        def step(carry, _):
            min_d, last = carry
            d = jnp.sum((pts - pts[last]) ** 2, axis=-1)
            min_d = jnp.minimum(min_d, d)
            nxt = jnp.argmax(min_d).astype(jnp.int32)
            return (min_d, nxt), nxt
        init = (jnp.full((pts.shape[0],), jnp.inf, dtype=pts.dtype), jnp.int32(0))
        _, rest = jax.lax.scan(step, init, None, length=n - 1)
        return jnp.concatenate([jnp.zeros((1,), jnp.int32), rest])
    return jax.vmap(per_cloud)(x)


def _group_fps(x):
    """Returns center-relative patches p (B,S,P,3) and centers c (B,S,3)."""
    idx = _fps(x, S)                                                   # (B, S)
    c = jnp.take_along_axis(x, idx[..., None], axis=1)                 # (B, S, 3)
    d2 = jnp.sum((c[:, :, None, :] - x[:, None, :, :]) ** 2, axis=-1)  # (B, S, N)
    nn = jnp.argsort(d2, axis=-1)[..., :PATCH]                         # (B, S, P)
    pts = jnp.take_along_axis(x[:, None], nn[..., None], axis=2)       # (B, S, P, 3)
    p = pts - c[:, :, None, :]                                         # center-relative
    return p, c


def _edge_features(p):
    """In-patch kNN graph, DGCNN-style edge features [x_i, x_j - x_i].

    Output layout: (K, 2*D, NP) with NP ordered np = p*(B*S) + b*S + s so that the
    256-point axis rides the 128-lane minor dim and PATCH slabs are aligned row slices
    after the stage-2 matmul inside the kernel.
    """
    # TODO(synk): argsorts / gathers / 5-D transpose stay in XLA; moving the gather in-kernel
    # via scalar-prefetched indices is possible but not done here.
    d2 = jnp.sum((p[..., :, None, :] - p[..., None, :, :]) ** 2, axis=-1)  # (B,S,P,P)
    nbr = jnp.argsort(d2, axis=-1)[..., :K]                                # (B,S,P,K) (incl. self)
    xj = jnp.take_along_axis(p[:, :, None, :, :], nbr[..., None], axis=3)  # (B,S,P,K,3)
    xi = jnp.broadcast_to(p[:, :, :, None, :], xj.shape)
    e = jnp.concatenate([xi, xj - xi], axis=-1)                            # (B,S,P,K,2*D)
    e = jnp.transpose(e, (3, 4, 2, 0, 1))                                  # (K, 2*D, P, B, S)
    return e.reshape(K, 2 * D, NP)


def _pack_weight_slab(params):
    """Pack all weights/biases (with attention folds) into one (R_TOT, 128) f32 slab.

    Call ONCE per parameter set and cache; only the center rows [R_C, R_C+B*S) change per call.
    """
    slab = jnp.zeros((R_TOT, LANES), jnp.float32)
    slab = slab.at[R_W1:R_W1 + HID, :2 * D].set(params['w1'].T)            # w1^T (HID, 2D)
    slab = slab.at[R_W1:R_W1 + HID, 2 * D].set(params['b1'].reshape(HID))  # b1 as a column
    slab = slab.at[R_W2:R_W2 + HID, :TOK].set(params['w2'])
    slab = slab.at[R_VEC + 0, :TOK].set(params['b2'].reshape(TOK))
    slab = slab.at[R_VEC + 1, :HID].set(params['bp1'].reshape(HID))
    slab = slab.at[R_VEC + 2, :TOK].set(params['bp2'].reshape(TOK))
    slab = slab.at[R_VEC + 3, :D_OUT].set(params['bo'].reshape(D_OUT))
    qk = (params['wk'] @ params['q']).reshape(TOK)                         # fold wk @ q
    slab = slab.at[R_VEC + 4, :TOK].set(qk)
    slab = slab.at[R_WP1:R_WP1 + D, :HID].set(params['wp1'])
    slab = slab.at[R_WP2:R_WP2 + HID, :TOK].set(params['wp2'])
    wvo = params['wv'] @ params['wo']                                      # fold wv @ wo
    slab = slab.at[R_WVO:R_WVO + TOK, :D_OUT].set(wvo)
    return slab


# ---------------------------------------------------------------------------
# Wrapper
# ---------------------------------------------------------------------------
def point_patch_v4_featnet(x, w_slab, ctx=None):
    del ctx  # see TODO(synk) above
    p, c = _group_fps(x)
    e = _edge_features(p)                                       # (K, 2*D, NP)
    # per-call data (patch centers) rides in the same slab -> only 2 input DMAs total
    slab = w_slab.at[R_C:R_C + B * S, :D].set(c.reshape(B * S, D))

    vmem = pltpu.MemorySpace.VMEM
    out = pl.pallas_call(
        _featnet_kernel,
        out_shape=jax.ShapeDtypeStruct((B, D_OUT), jnp.float32),
        in_specs=[pl.BlockSpec(memory_space=vmem),              # e  (whole array in VMEM)
                  pl.BlockSpec(memory_space=vmem)],             # slab
        out_specs=pl.BlockSpec(memory_space=vmem),
    )(e, slab)

    # forward: x.reshape(*s[:-2], dim_out)
    return out.reshape(*x.shape[:-2], D_OUT)


def _init_params(key):
    ks = jax.random.split(key, 8)

    def lin(k, fan_in, shape):
        return jax.random.normal(k, shape, jnp.float32) / jnp.sqrt(jnp.float32(fan_in))

    return {
        # KNNPatchEncoder
        'w1': lin(ks[0], 2 * D, (2 * D, HID)),
        'b1': jnp.zeros((1, HID), jnp.float32),
        'w2': lin(ks[1], HID, (HID, TOK)),
        'b2': jnp.zeros((1, TOK), jnp.float32),
        # pos_embed mlp
        'wp1': lin(ks[2], D, (D, HID)),
        'bp1': jnp.zeros((1, HID), jnp.float32),
        'wp2': lin(ks[3], HID, (HID, TOK)),
        'bp2': jnp.zeros((1, TOK), jnp.float32),
        # patch-wise attention encoder
        'wk': lin(ks[4], TOK, (TOK, TOK)),
        'wv': lin(ks[5], TOK, (TOK, TOK)),
        'q': lin(ks[6], TOK, (TOK, 1)),
        'wo': lin(ks[7], TOK, (TOK, D_OUT)),
        'bo': jnp.zeros((1, D_OUT), jnp.float32),
    }


if __name__ == "__main__":
    key = jax.random.PRNGKey(0)
    kx, kp = jax.random.split(key)
    x = jax.random.normal(kx, (B, N, D), jnp.float32)      # (batch, n_points, 3)
    params = _init_params(kp)
    w_slab = _pack_weight_slab(params)                     # packed once, cached across calls
    ctx = {}                                               # context dict (unused)

    fwd = jax.jit(point_patch_v4_featnet)
    out = fwd(x, w_slab, ctx)
    jax.block_until_ready(out)
    assert out.shape == (B, D_OUT) and out.dtype == jnp.float32
    print("KERNEL_OK")
</pallas_src>

<mosaic_0001>
module attributes {stable_mosaic.version = 11 : i64} {
  func.func @_featnet_kernel(%arg0: memref<8x6x256xf32, #tpu.memory_space<vmem>>, %arg1: memref<192x128xf32, #tpu.memory_space<vmem>>, %arg2: memref<2x128xf32, #tpu.memory_space<vmem>>) attributes {dimension_semantics = [], scalar_prefetch = 0 : i64, scratch_operands = 0 : i64, tpu.core_type = #tpu.core_type<tc>} {
    %c0 = arith.constant 0 : index
    %c0_0 = arith.constant 0 : index
    %0 = vector.load %arg1[%c0, %c0_0] : memref<192x128xf32, #tpu.memory_space<vmem>>, vector<32x6xf32>
    %c0_1 = arith.constant 0 : index
    %c0_2 = arith.constant 0 : index
    %c0_3 = arith.constant 0 : index
    %1 = vector.load %arg0[%c0_1, %c0_2, %c0_3] : memref<8x6x256xf32, #tpu.memory_space<vmem>>, vector<1x6x256xf32>
    %2 = vector.shape_cast %1 : vector<1x6x256xf32> to vector<6x256xf32>
    %cst = arith.constant dense<0.000000e+00> : vector<32x256xf32>
    %3 = tpu.matmul %0, %2, %cst {dimension_numbers = #tpu.dot_dimension_numbers<[1], [0], [0], [1], [0, 0, 1, 1], [], []>} : vector<32x6xf32>, vector<6x256xf32>, vector<32x256xf32> -> vector<32x256xf32>
    %c1 = arith.constant 1 : index
    %c0_4 = arith.constant 0 : index
    %c0_5 = arith.constant 0 : index
    %4 = vector.load %arg0[%c1, %c0_4, %c0_5] : memref<8x6x256xf32, #tpu.memory_space<vmem>>, vector<1x6x256xf32>
    %5 = vector.shape_cast %4 : vector<1x6x256xf32> to vector<6x256xf32>
    %cst_6 = arith.constant dense<0.000000e+00> : vector<32x256xf32>
    %6 = tpu.matmul %0, %5, %cst_6 {dimension_numbers = #tpu.dot_dimension_numbers<[1], [0], [0], [1], [0, 0, 1, 1], [], []>} : vector<32x6xf32>, vector<6x256xf32>, vector<32x256xf32> -> vector<32x256xf32>
    %7 = arith.maximumf %3, %6 : vector<32x256xf32>
    %c2 = arith.constant 2 : index
    %c0_7 = arith.constant 0 : index
    %c0_8 = arith.constant 0 : index
    %8 = vector.load %arg0[%c2, %c0_7, %c0_8] : memref<8x6x256xf32, #tpu.memory_space<vmem>>, vector<1x6x256xf32>
    %9 = vector.shape_cast %8 : vector<1x6x256xf32> to vector<6x256xf32>
    %cst_9 = arith.constant dense<0.000000e+00> : vector<32x256xf32>
    %10 = tpu.matmul %0, %9, %cst_9 {dimension_numbers = #tpu.dot_dimension_numbers<[1], [0], [0], [1], [0, 0, 1, 1], [], []>} : vector<32x6xf32>, vector<6x256xf32>, vector<32x256xf32> -> vector<32x256xf32>
    %11 = arith.maximumf %7, %10 : vector<32x256xf32>
    %c3 = arith.constant 3 : index
    %c0_10 = arith.constant 0 : index
    %c0_11 = arith.constant 0 : index
    %12 = vector.load %arg0[%c3, %c0_10, %c0_11] : memref<8x6x256xf32, #tpu.memory_space<vmem>>, vector<1x6x256xf32>
    %13 = vector.shape_cast %12 : vector<1x6x256xf32> to vector<6x256xf32>
    %cst_12 = arith.constant dense<0.000000e+00> : vector<32x256xf32>
    %14 = tpu.matmul %0, %13, %cst_12 {dimension_numbers = #tpu.dot_dimension_numbers<[1], [0], [0], [1], [0, 0, 1, 1], [], []>} : vector<32x6xf32>, vector<6x256xf32>, vector<32x256xf32> -> vector<32x256xf32>
    %15 = arith.maximumf %11, %14 : vector<32x256xf32>
    %c4 = arith.constant 4 : index
    %c0_13 = arith.constant 0 : index
    %c0_14 = arith.constant 0 : index
    %16 = vector.load %arg0[%c4, %c0_13, %c0_14] : memref<8x6x256xf32, #tpu.memory_space<vmem>>, vector<1x6x256xf32>
    %17 = vector.shape_cast %16 : vector<1x6x256xf32> to vector<6x256xf32>
    %cst_15 = arith.constant dense<0.000000e+00> : vector<32x256xf32>
    %18 = tpu.matmul %0, %17, %cst_15 {dimension_numbers = #tpu.dot_dimension_numbers<[1], [0], [0], [1], [0, 0, 1, 1], [], []>} : vector<32x6xf32>, vector<6x256xf32>, vector<32x256xf32> -> vector<32x256xf32>
    %19 = arith.maximumf %15, %18 : vector<32x256xf32>
    %c5 = arith.constant 5 : index
    %c0_16 = arith.constant 0 : index
    %c0_17 = arith.constant 0 : index
    %20 = vector.load %arg0[%c5, %c0_16, %c0_17] : memref<8x6x256xf32, #tpu.memory_space<vmem>>, vector<1x6x256xf32>
    %21 = vector.shape_cast %20 : vector<1x6x256xf32> to vector<6x256xf32>
    %cst_18 = arith.constant dense<0.000000e+00> : vector<32x256xf32>
    %22 = tpu.matmul %0, %21, %cst_18 {dimension_numbers = #tpu.dot_dimension_numbers<[1], [0], [0], [1], [0, 0, 1, 1], [], []>} : vector<32x6xf32>, vector<6x256xf32>, vector<32x256xf32> -> vector<32x256xf32>
    %23 = arith.maximumf %19, %22 : vector<32x256xf32>
    %c6 = arith.constant 6 : index
    %c0_19 = arith.constant 0 : index
    %c0_20 = arith.constant 0 : index
    %24 = vector.load %arg0[%c6, %c0_19, %c0_20] : memref<8x6x256xf32, #tpu.memory_space<vmem>>, vector<1x6x256xf32>
    %25 = vector.shape_cast %24 : vector<1x6x256xf32> to vector<6x256xf32>
    %cst_21 = arith.constant dense<0.000000e+00> : vector<32x256xf32>
    %26 = tpu.matmul %0, %25, %cst_21 {dimension_numbers = #tpu.dot_dimension_numbers<[1], [0], [0], [1], [0, 0, 1, 1], [], []>} : vector<32x6xf32>, vector<6x256xf32>, vector<32x256xf32> -> vector<32x256xf32>
    %27 = arith.maximumf %23, %26 : vector<32x256xf32>
    %c7 = arith.constant 7 : index
    %c0_22 = arith.constant 0 : index
    %c0_23 = arith.constant 0 : index
    %28 = vector.load %arg0[%c7, %c0_22, %c0_23] : memref<8x6x256xf32, #tpu.memory_space<vmem>>, vector<1x6x256xf32>
    %29 = vector.shape_cast %28 : vector<1x6x256xf32> to vector<6x256xf32>
    %cst_24 = arith.constant dense<0.000000e+00> : vector<32x256xf32>
    %30 = tpu.matmul %0, %29, %cst_24 {dimension_numbers = #tpu.dot_dimension_numbers<[1], [0], [0], [1], [0, 0, 1, 1], [], []>} : vector<32x6xf32>, vector<6x256xf32>, vector<32x256xf32> -> vector<32x256xf32>
    %31 = arith.maximumf %27, %30 : vector<32x256xf32>
    %c0_25 = arith.constant 0 : index
    %c6_26 = arith.constant 6 : index
    %32 = vector.load %arg1[%c0_25, %c6_26] : memref<192x128xf32, #tpu.memory_space<vmem>>, vector<32x1xf32>
    %33 = vector.broadcast %32 : vector<32x1xf32> to vector<32x256xf32>
    %34 = arith.addf %31, %33 : vector<32x256xf32>
    %cst_27 = arith.constant 0.000000e+00 : f32
    %35 = vector.broadcast %cst_27 : f32 to vector<32x256xf32>
    %36 = arith.maximumf %34, %35 : vector<32x256xf32>
    %c32 = arith.constant 32 : index
    %c0_28 = arith.constant 0 : index
    %37 = vector.load %arg1[%c32, %c0_28] : memref<192x128xf32, #tpu.memory_space<vmem>>, vector<32x64xf32>
    %c64 = arith.constant 64 : index
    %c0_29 = arith.constant 0 : index
    %38 = vector.load %arg1[%c64, %c0_29] : memref<192x128xf32, #tpu.memory_space<vmem>>, vector<1x64xf32>
    %39 = tpu.transpose %36, [1, 0] : vector<32x256xf32> -> vector<256x32xf32>
    %cst_30 = arith.constant dense<0.000000e+00> : vector<256x64xf32>
    %40 = tpu.matmul %39, %37, %cst_30 {dimension_numbers = #tpu.dot_dimension_numbers<[1], [0], [0], [1], [0, 0, 1, 1], [], []>} : vector<256x32xf32>, vector<32x64xf32>, vector<256x64xf32> -> vector<256x64xf32>
    %41 = vector.broadcast %38 : vector<1x64xf32> to vector<256x64xf32>
    %42 = arith.addf %40, %41 : vector<256x64xf32>
    %43 = vector.extract_strided_slice %42 {offsets = [0, 0], sizes = [16, 64], strides = [1, 1]} : vector<256x64xf32> to vector<16x64xf32>
    %44 = vector.extract_strided_slice %42 {offsets = [16, 0], sizes = [16, 64], strides = [1, 1]} : vector<256x64xf32> to vector<16x64xf32>
    %45 = arith.maximumf %43, %44 : vector<16x64xf32>
    %46 = vector.extract_strided_slice %42 {offsets = [32, 0], sizes = [16, 64], strides = [1, 1]} : vector<256x64xf32> to vector<16x64xf32>
    %47 = arith.maximumf %45, %46 : vector<16x64xf32>
    %48 = vector.extract_strided_slice %42 {offsets = [48, 0], sizes = [16, 64], strides = [1, 1]} : vector<256x64xf32> to vector<16x64xf32>
    %49 = arith.maximumf %47, %48 : vector<16x64xf32>
    %50 = vector.extract_strided_slice %42 {offsets = [64, 0], sizes = [16, 64], strides = [1, 1]} : vector<256x64xf32> to vector<16x64xf32>
    %51 = arith.maximumf %49, %50 : vector<16x64xf32>
    %52 = vector.extract_strided_slice %42 {offsets = [80, 0], sizes = [16, 64], strides = [1, 1]} : vector<256x64xf32> to vector<16x64xf32>
    %53 = arith.maximumf %51, %52 : vector<16x64xf32>
    %54 = vector.extract_strided_slice %42 {offsets = [96, 0], sizes = [16, 64], strides = [1, 1]} : vector<256x64xf32> to vector<16x64xf32>
    %55 = arith.maximumf %53, %54 : vector<16x64xf32>
    %56 = vector.extract_strided_slice %42 {offsets = [112, 0], sizes = [16, 64], strides = [1, 1]} : vector<256x64xf32> to vector<16x64xf32>
    %57 = arith.maximumf %55, %56 : vector<16x64xf32>
    %58 = vector.extract_strided_slice %42 {offsets = [128, 0], sizes = [16, 64], strides = [1, 1]} : vector<256x64xf32> to vector<16x64xf32>
    %59 = arith.maximumf %57, %58 : vector<16x64xf32>
    %60 = vector.extract_strided_slice %42 {offsets = [144, 0], sizes = [16, 64], strides = [1, 1]} : vector<256x64xf32> to vector<16x64xf32>
    %61 = arith.maximumf %59, %60 : vector<16x64xf32>
    %62 = vector.extract_strided_slice %42 {offsets = [160, 0], sizes = [16, 64], strides = [1, 1]} : vector<256x64xf32> to vector<16x64xf32>
    %63 = arith.maximumf %61, %62 : vector<16x64xf32>
    %64 = vector.extract_strided_slice %42 {offsets = [176, 0], sizes = [16, 64], strides = [1, 1]} : vector<256x64xf32> to vector<16x64xf32>
    %65 = arith.maximumf %63, %64 : vector<16x64xf32>
    %66 = vector.extract_strided_slice %42 {offsets = [192, 0], sizes = [16, 64], strides = [1, 1]} : vector<256x64xf32> to vector<16x64xf32>
    %67 = arith.maximumf %65, %66 : vector<16x64xf32>
    %68 = vector.extract_strided_slice %42 {offsets = [208, 0], sizes = [16, 64], strides = [1, 1]} : vector<256x64xf32> to vector<16x64xf32>
    %69 = arith.maximumf %67, %68 : vector<16x64xf32>
    %70 = vector.extract_strided_slice %42 {offsets = [224, 0], sizes = [16, 64], strides = [1, 1]} : vector<256x64xf32> to vector<16x64xf32>
    %71 = arith.maximumf %69, %70 : vector<16x64xf32>
    %72 = vector.extract_strided_slice %42 {offsets = [240, 0], sizes = [16, 64], strides = [1, 1]} : vector<256x64xf32> to vector<16x64xf32>
    %73 = arith.maximumf %71, %72 : vector<16x64xf32>
    %c72 = arith.constant 72 : index
    %c0_31 = arith.constant 0 : index
    %74 = vector.load %arg1[%c72, %c0_31] : memref<192x128xf32, #tpu.memory_space<vmem>>, vector<3x32xf32>
    %c65 = arith.constant 65 : index
    %c0_32 = arith.constant 0 : index
    %75 = vector.load %arg1[%c65, %c0_32] : memref<192x128xf32, #tpu.memory_space<vmem>>, vector<1x32xf32>
    %c80 = arith.constant 80 : index
    %c0_33 = arith.constant 0 : index
    %76 = vector.load %arg1[%c80, %c0_33] : memref<192x128xf32, #tpu.memory_space<vmem>>, vector<32x64xf32>
    %c66 = arith.constant 66 : index
    %c0_34 = arith.constant 0 : index
    %77 = vector.load %arg1[%c66, %c0_34] : memref<192x128xf32, #tpu.memory_space<vmem>>, vector<1x64xf32>
    %c176 = arith.constant 176 : index
    %c0_35 = arith.constant 0 : index
    %78 = vector.load %arg1[%c176, %c0_35] : memref<192x128xf32, #tpu.memory_space<vmem>>, vector<16x3xf32>
    %cst_36 = arith.constant dense<0.000000e+00> : vector<16x32xf32>
    %79 = tpu.matmul %78, %74, %cst_36 {dimension_numbers = #tpu.dot_dimension_numbers<[1], [0], [0], [1], [0, 0, 1, 1], [], []>} : vector<16x3xf32>, vector<3x32xf32>, vector<16x32xf32> -> vector<16x32xf32>
    %80 = vector.broadcast %75 : vector<1x32xf32> to vector<16x32xf32>
    %81 = arith.addf %79, %80 : vector<16x32xf32>
    %82 = arith.mulf %81, %81 : vector<16x32xf32>
    %83 = arith.mulf %81, %82 : vector<16x32xf32>
    %cst_37 = arith.constant 4.471500e-02 : f32
    %84 = vector.broadcast %cst_37 : f32 to vector<16x32xf32>
    %85 = arith.mulf %84, %83 : vector<16x32xf32>
    %86 = arith.addf %81, %85 : vector<16x32xf32>
    %cst_38 = arith.constant 0.797884583 : f32
    %87 = vector.broadcast %cst_38 : f32 to vector<16x32xf32>
    %88 = arith.mulf %87, %86 : vector<16x32xf32>
    %89 = math.tanh %88 : vector<16x32xf32>
    %cst_39 = arith.constant 1.000000e+00 : f32
    %90 = vector.broadcast %cst_39 : f32 to vector<16x32xf32>
    %91 = arith.addf %90, %89 : vector<16x32xf32>
    %cst_40 = arith.constant 5.000000e-01 : f32
    %92 = vector.broadcast %cst_40 : f32 to vector<16x32xf32>
    %93 = arith.mulf %92, %91 : vector<16x32xf32>
    %94 = arith.mulf %81, %93 : vector<16x32xf32>
    %cst_41 = arith.constant dense<0.000000e+00> : vector<16x64xf32>
    %95 = tpu.matmul %94, %76, %cst_41 {dimension_numbers = #tpu.dot_dimension_numbers<[1], [0], [0], [1], [0, 0, 1, 1], [], []>} : vector<16x32xf32>, vector<32x64xf32>, vector<16x64xf32> -> vector<16x64xf32>
    %96 = vector.broadcast %77 : vector<1x64xf32> to vector<16x64xf32>
    %97 = arith.addf %95, %96 : vector<16x64xf32>
    %98 = arith.addf %73, %97 : vector<16x64xf32>
    %c68 = arith.constant 68 : index
    %c0_42 = arith.constant 0 : index
    %99 = vector.load %arg1[%c68, %c0_42] : memref<192x128xf32, #tpu.memory_space<vmem>>, vector<1x64xf32>
    %100 = vector.broadcast %99 : vector<1x64xf32> to vector<16x64xf32>
    %101 = arith.mulf %98, %100 : vector<16x64xf32>
    %cst_43 = arith.constant dense<0.000000e+00> : vector<16xf32>
    %102 = vector.multi_reduction <add>, %101, %cst_43 [1] : vector<16x64xf32> to vector<16xf32>
    %103 = vector.shape_cast %102 : vector<16xf32> to vector<16x1xf32>
    %cst_44 = arith.constant 1.250000e-01 : f32
    %104 = vector.broadcast %cst_44 : f32 to vector<16x1xf32>
    %105 = arith.mulf %103, %104 : vector<16x1xf32>
    %106 = vector.shape_cast %105 : vector<16x1xf32> to vector<2x8x1xf32>
    %cst_45 = arith.constant dense<0xFF800000> : vector<2x1xf32>
    %107 = vector.multi_reduction <maximumf>, %106, %cst_45 [1] : vector<2x8x1xf32> to vector<2x1xf32>
    %108 = vector.shape_cast %107 : vector<2x1xf32> to vector<2x1x1xf32>
    %109 = vector.broadcast %108 : vector<2x1x1xf32> to vector<2x8x1xf32>
    %110 = arith.subf %106, %109 : vector<2x8x1xf32>
    %111 = math.exp %110 : vector<2x8x1xf32>
    %cst_46 = arith.constant dense<0.000000e+00> : vector<2x1xf32>
    %112 = vector.multi_reduction <add>, %111, %cst_46 [1] : vector<2x8x1xf32> to vector<2x1xf32>
    %113 = vector.shape_cast %112 : vector<2x1xf32> to vector<2x1x1xf32>
    %114 = vector.broadcast %113 : vector<2x1x1xf32> to vector<2x8x1xf32>
    %115 = arith.divf %111, %114 : vector<2x8x1xf32>
    %116 = vector.shape_cast %98 : vector<16x64xf32> to vector<2x8x64xf32>
    %117 = vector.broadcast %115 : vector<2x8x1xf32> to vector<2x8x64xf32>
    %118 = arith.mulf %117, %116 : vector<2x8x64xf32>
    %cst_47 = arith.constant dense<0.000000e+00> : vector<2x64xf32>
    %119 = vector.multi_reduction <add>, %118, %cst_47 [1] : vector<2x8x64xf32> to vector<2x64xf32>
    %c112 = arith.constant 112 : index
    %c0_48 = arith.constant 0 : index
    %120 = vector.load %arg1[%c112, %c0_48] : memref<192x128xf32, #tpu.memory_space<vmem>>, vector<64x128xf32>
    %c67 = arith.constant 67 : index
    %c0_49 = arith.constant 0 : index
    %121 = vector.load %arg1[%c67, %c0_49] : memref<192x128xf32, #tpu.memory_space<vmem>>, vector<1x128xf32>
    %cst_50 = arith.constant dense<0.000000e+00> : vector<2x128xf32>
    %122 = tpu.matmul %119, %120, %cst_50 {dimension_numbers = #tpu.dot_dimension_numbers<[1], [0], [0], [1], [0, 0, 1, 1], [], []>} : vector<2x64xf32>, vector<64x128xf32>, vector<2x128xf32> -> vector<2x128xf32>
    %123 = vector.broadcast %121 : vector<1x128xf32> to vector<2x128xf32>
    %124 = arith.addf %122, %123 : vector<2x128xf32>
    %c0_51 = arith.constant 0 : index
    %c0_52 = arith.constant 0 : index
    %125 = vector.load %arg2[%c0_51, %c0_52] : memref<2x128xf32, #tpu.memory_space<vmem>>, vector<2x128xf32>
    tpu.vector_store %arg2[%c0_51, %c0_52], %124 {strides = array<i32>} : memref<2x128xf32, #tpu.memory_space<vmem>>, vector<2x128xf32>,
    return
  }
}

</mosaic_0001>

<bundles_post_ra>
// kernel: custom-call.10
= control target key start
LH: loop header
LB: loop body
LE: loop exit
PB: predicated region body
PF: predicated region fallthrough
CT: control target
= control target key end

     0   :  { %s6_s0 = inlined_call_operand.vmem [shape: s32[7,2], index: 0, kind: output, shape index: {}]  }

// kernel: custom-call.8
= control target key start
LH: loop header
LB: loop body
LE: loop exit
PB: predicated region body
PF: predicated region fallthrough
CT: control target
= control target key end

     0   :  { %s6_s0 = inlined_call_operand.vmem [shape: f32[2,128], index: 0, kind: output, shape index: {}]  }

// kernel: point_patch_v4_featnet.1
= control target key start
LH: loop header
LB: loop body
LE: loop exit
PB: predicated region body
PF: predicated region fallthrough
CT: control target
= control target key end

     0   :  { %vm31_vm0 = vcmask 1045504   ;;  %vm18_vm1 = vcmask 48128   ;;  %s1861_s0 = inlined_call_operand.vmem [shape: f32[8,6,256], index: 0, kind: input, shape index: {}]   ;;  %s1862_s1 = inlined_call_operand.vmem [shape: f32[192,128], index: 1, kind: input, shape index: {}]   ;;  %s1863_s2 = inlined_call_operand.hbm [shape: f32[2,128], index: 2, kind: output, shape index: {}]  }
   0x1   :  { %v16_v0 = vld [vmem:[%s1861_s0] sm:$0x3f]  ;;  %v1209_v1 = vld [vmem:[%s1861_s0 + $0x10] sm:$0x3f]  ;;  %v1210_v3 = vld [vmem:[%s1861_s0 + $0x18] sm:$0x3f] }
   0x2   :  { %v1417_v2 = vld [vmem:[%s1862_s1] sm:$0xff]  ;;  %1199 = vmatpush.msk.msra.mxu0 %vm31_vm0, %v16_v0  ;;  %1211 = vmatpush.msk.msra.mxu2 %vm31_vm0, %v1209_v1  ;;  %v1233_v4 = vld [vmem:[%s1861_s0 + $0x30] sm:$0x3f]  ;;  %v17_v5 = vld [vmem:[%s1861_s0 + $0x8] sm:$0x3f] }
   0x3   :  { %1216 = vmatpush.msk.msra.mxu3 %vm31_vm0, %v1210_v3  ;;  %1200 = vmatmul.msk.f32.vlgmr.msra.gmra.mxu0 %vm18_vm1, %v1417_v2  ;;  %v1221_v6 = vld [vmem:[%s1861_s0 + $0x20] sm:$0x3f]  ;;  %v1234_v7 = vld [vmem:[%s1861_s0 + $0x38] sm:$0x3f]  ;;  %v1257_v8 = vld [vmem:[%s1861_s0 + $0x50] sm:$0x3f] }
   0x4   :  { %1212 = vmatmul.msk.f32.vlgmr.msra.gmra.mxu2 %vm18_vm1, %v1417_v2  ;;  %1217 = vmatmul.msk.f32.vlgmr.msra.gmra.mxu3 %vm18_vm1, %v1417_v2  ;;  %v1222_v9 = vld [vmem:[%s1861_s0 + $0x28] sm:$0x3f]  ;;  %v1245_v10 = vld [vmem:[%s1861_s0 + $0x40] sm:$0x3f] }
   0x5   :  { %1235 = vmatpush.msk.msrb.mxu2 %vm31_vm0, %v1233_v4  ;;  %1204 = vmatpush.msk.msra.mxu1 %vm31_vm0, %v17_v5 }
   0x6   :  { %1205 = vmatmul.msk.f32.vlgmr.msra.gmra.mxu1 %vm18_vm1, %v1417_v2  ;;  %1223 = vmatpush.msk.msrb.mxu0 %vm31_vm0, %v1221_v6 }
   0x7   :  { %1240 = vmatpush.msk.msrb.mxu3 %vm31_vm0, %v1234_v7  ;;  %1259 = vmatpush.msk.msra.mxu2 %vm31_vm0, %v1257_v8 }
   0x8   :  { %7 = vsyncpa [#allocation3], 0  ;;  %v1462_v11 = vld [vmem:[%s1862_s1 + $0x8] sm:$0xff]  ;;  %1228 = vmatpush.msk.msrb.mxu1 %vm31_vm0, %v1222_v9  ;;  %1247 = vmatpush.msk.msra.mxu0 %vm31_vm0, %v1245_v10  ;;  %v1477_v12 = vld [vmem:[%s1862_s1 + $0x10] sm:$0xff]  ;;  %v1391_v20 = vmov 6   ;;  %vm723_vm2 = vcmask 261120  }
   0x9   :  { %v1490_v13 = vld [vmem:[%s1862_s1 + $0x18] sm:$0xff]  ;;  %v1281_v15 = vld [vmem:[%s1861_s0 + $0x70] sm:$0x3f]  ;;  %v1246_v16 = vld [vmem:[%s1861_s0 + $0x48] sm:$0x3f]  ;;  %1346 = vset.pattern.permute.xlu0 %v1391_v20  ;;  %1347 = vset.pattern.permute.xlu1 %v1391_v20  ;;  %vm980_vm3 = vcmask 1042432  }
   0xa   :  { %v1258_v14 = vld [vmem:[%s1861_s0 + $0x58] sm:$0x3f]  ;;  %1252 = vmatpush.msk.msra.mxu1 %vm31_vm0, %v1246_v16  ;;  %v1269_v17 = vld [vmem:[%s1861_s0 + $0x60] sm:$0x3f]  ;;  %v1270_v19 = vld [vmem:[%s1861_s0 + $0x68] sm:$0x3f]  ;;  %622 = vperm.xlu0 %1346, %v1417_v2  }
   0xb   :  { %1201 = vmatmul.msk.f32.gmra.mxu0 %vm18_vm1, %v1462_v11  ;;  %1264 = vmatpush.msk.msra.mxu3 %vm31_vm0, %v1258_v14  ;;  %v1282_v18 = vld [vmem:[%s1861_s0 + $0x78] sm:$0x3f]  ;;  %vm973_vm4 = vcmask 23552   ;;  %vm1061_vm5 = vcmask 523264   ;;  %vm1158_vm14 = vcmask 1041409   ;;  %s1392_s11 = smov [#allocation2]  }
   0xc   :  { %1213 = vmatmul.msk.f32.gmra.mxu2 %vm18_vm1, %v1462_v11  ;;  %1218 = vmatmul.msk.f32.gmra.mxu3 %vm18_vm1, %v1462_v11  ;;  %s1188_s12 = sshll.u32 %s1392_s11, 4  ;;  %s1190_s15 = sshll.u32 %s1863_s2, 4  ;;  %s1189_s12 = int_to_ptr.vmem [resolvable:$true] %s1188_s12  ;;  %s1191_s15 = int_to_ptr.hbm [resolvable:$true] %s1190_s15 }
   0xd   :  { %630 = vperm.xlu1 %1347, %v1477_v12  }
   0xe   :  { %1206 = vmatmul.msk.f32.gmra.mxu1 %vm18_vm1, %v1462_v11 }
  0x12   :  { %626 = vperm.xlu0 %1346, %v1462_v11  }
  0x13   :  { %1202 = vmatmul.msk.f32.gmra.mxu0 %vm18_vm1, %v1477_v12 }
  0x14   :  { %1214 = vmatmul.msk.f32.gmra.mxu2 %vm18_vm1, %v1477_v12  ;;  %1219 = vmatmul.msk.f32.gmra.mxu3 %vm18_vm1, %v1477_v12 }
  0x15   :  { %634 = vperm.xlu1 %1347, %v1490_v13  }
  0x16   :  { %1207 = vmatmul.msk.f32.gmra.mxu1 %vm18_vm1, %v1477_v12 }
  0x1b   :  { %1203 = vmatmul.msk.f32.gmra.mxu0 %vm18_vm1, %v1490_v13 }
  0x1c   :  { %1215 = vmatmul.msk.f32.gmra.mxu2 %vm18_vm1, %v1490_v13  ;;  %1220 = vmatmul.msk.f32.gmra.mxu3 %vm18_vm1, %v1490_v13 }
  0x1e   :  { %1208 = vmatmul.msk.f32.gmra.mxu1 %vm18_vm1, %v1490_v13 }
  0x23   :  { %1224 = vmatmul.msk.f32.vlgmr.msrb.gmra.mxu0 %vm18_vm1, %v1417_v2 }
  0x24   :  { %1236 = vmatmul.msk.f32.vlgmr.msrb.gmra.mxu2 %vm18_vm1, %v1417_v2  ;;  %1241 = vmatmul.msk.f32.vlgmr.msrb.gmra.mxu3 %vm18_vm1, %v1417_v2 }
  0x25   :  { %1283 = vmatpush.msk.msrb.mxu2 %vm31_vm0, %v1281_v15  ;;  %1271 = vmatpush.msk.msrb.mxu0 %vm31_vm0, %v1269_v17 }
  0x26   :  { %1229 = vmatmul.msk.f32.vlgmr.msrb.gmra.mxu1 %vm18_vm1, %v1417_v2  ;;  %1288 = vmatpush.msk.msrb.mxu3 %vm31_vm0, %v1282_v18 }
  0x27   :  { %1276 = vmatpush.msk.msrb.mxu1 %vm31_vm0, %v1270_v19 }
  0x2b   :  { %1225 = vmatmul.msk.f32.gmra.mxu0 %vm18_vm1, %v1462_v11 }
  0x2c   :  { %1237 = vmatmul.msk.f32.gmra.mxu2 %vm18_vm1, %v1462_v11  ;;  %1242 = vmatmul.msk.f32.gmra.mxu3 %vm18_vm1, %v1462_v11 }
  0x2e   :  { %1230 = vmatmul.msk.f32.gmra.mxu1 %vm18_vm1, %v1462_v11 }
  0x33   :  { %1226 = vmatmul.msk.f32.gmra.mxu0 %vm18_vm1, %v1477_v12 }
  0x34   :  { %1238 = vmatmul.msk.f32.gmra.mxu2 %vm18_vm1, %v1477_v12  ;;  %1243 = vmatmul.msk.f32.gmra.mxu3 %vm18_vm1, %v1477_v12 }
  0x36   :  { %1231 = vmatmul.msk.f32.gmra.mxu1 %vm18_vm1, %v1477_v12 }
  0x3b   :  { %1227 = vmatmul.msk.f32.gmra.mxu0 %vm18_vm1, %v1490_v13 }
  0x3c   :  { %1239 = vmatmul.msk.f32.gmra.mxu2 %vm18_vm1, %v1490_v13  ;;  %1244 = vmatmul.msk.f32.gmra.mxu3 %vm18_vm1, %v1490_v13 }
  0x3e   :  { %1232 = vmatmul.msk.f32.gmra.mxu1 %vm18_vm1, %v1490_v13 }
  0x43   :  { %1248 = vmatmul.msk.f32.vlgmr.msra.gmra.mxu0 %vm18_vm1, %v1417_v2 }
  0x44   :  { %1260 = vmatmul.msk.f32.vlgmr.msra.gmra.mxu2 %vm18_vm1, %v1417_v2  ;;  %1265 = vmatmul.msk.f32.vlgmr.msra.gmra.mxu3 %vm18_vm1, %v1417_v2 }
  0x46   :  { %1253 = vmatmul.msk.f32.vlgmr.msra.gmra.mxu1 %vm18_vm1, %v1417_v2 }
  0x4b   :  { %1249 = vmatmul.msk.f32.gmra.mxu0 %vm18_vm1, %v1462_v11 }
  0x4c   :  { %1261 = vmatmul.msk.f32.gmra.mxu2 %vm18_vm1, %v1462_v11  ;;  %1266 = vmatmul.msk.f32.gmra.mxu3 %vm18_vm1, %v1462_v11 }
  0x4e   :  { %1254 = vmatmul.msk.f32.gmra.mxu1 %vm18_vm1, %v1462_v11 }
  0x53   :  { %1250 = vmatmul.msk.f32.gmra.mxu0 %vm18_vm1, %v1477_v12 }
  0x54   :  { %1262 = vmatmul.msk.f32.gmra.mxu2 %vm18_vm1, %v1477_v12  ;;  %1267 = vmatmul.msk.f32.gmra.mxu3 %vm18_vm1, %v1477_v12 }
  0x56   :  { %1255 = vmatmul.msk.f32.gmra.mxu1 %vm18_vm1, %v1477_v12 }
  0x5b   :  { %1251 = vmatmul.msk.f32.gmra.mxu0 %vm18_vm1, %v1490_v13 }
  0x5c   :  { %1263 = vmatmul.msk.f32.gmra.mxu2 %vm18_vm1, %v1490_v13  ;;  %1268 = vmatmul.msk.f32.gmra.mxu3 %vm18_vm1, %v1490_v13 }
  0x5e   :  { %1256 = vmatmul.msk.f32.gmra.mxu1 %vm18_vm1, %v1490_v13 }
  0x63   :  { %1272 = vmatmul.msk.f32.vlgmr.msrb.gmra.mxu0 %vm18_vm1, %v1417_v2 }
  0x64   :  { %1284 = vmatmul.msk.f32.vlgmr.msrb.gmra.mxu2 %vm18_vm1, %v1417_v2  ;;  %1289 = vmatmul.msk.f32.vlgmr.msrb.gmra.mxu3 %vm18_vm1, %v1417_v2 }
  0x66   :  { %1277 = vmatmul.msk.f32.vlgmr.msrb.gmra.mxu1 %vm18_vm1, %v1417_v2 }
  0x6b   :  { %1273 = vmatmul.msk.f32.gmra.mxu0 %vm18_vm1, %v1462_v11 }
  0x6c   :  { %1285 = vmatmul.msk.f32.gmra.mxu2 %vm18_vm1, %v1462_v11  ;;  %1290 = vmatmul.msk.f32.gmra.mxu3 %vm18_vm1, %v1462_v11 }
  0x6e   :  { %1278 = vmatmul.msk.f32.gmra.mxu1 %vm18_vm1, %v1462_v11 }
  0x73   :  { %1274 = vmatmul.msk.f32.gmra.mxu0 %vm18_vm1, %v1477_v12 }
  0x74   :  { %1286 = vmatmul.msk.f32.gmra.mxu2 %vm18_vm1, %v1477_v12  ;;  %1291 = vmatmul.msk.f32.gmra.mxu3 %vm18_vm1, %v1477_v12 }
  0x76   :  { %1279 = vmatmul.msk.f32.gmra.mxu1 %vm18_vm1, %v1477_v12 }
  0x7b   :  { %1275 = vmatmul.msk.f32.gmra.mxu0 %vm18_vm1, %v1490_v13 }
  0x7c   :  { %1287 = vmatmul.msk.f32.gmra.mxu2 %vm18_vm1, %v1490_v13  ;;  %1292 = vmatmul.msk.f32.gmra.mxu3 %vm18_vm1, %v1490_v13 }
  0x7e   :  { %1280 = vmatmul.msk.f32.gmra.mxu1 %vm18_vm1, %v1490_v13 }
  0x80   :  { %v55_v21 = vpop.f32.mrf.mxu0 }
  0x83   :  { %v84_v22 = vpop.f32.mrf.mxu1 }
  0x87   :  { %v122_v23 = vpop.f32.mrf.mxu2  ;;  %v151_v24 = vpop.f32.mrf.mxu3 }
  0x88   :  { %v1624_v25 = vpop.f32.mrf.mxu0  ;;  %v164_v1 = vmax.f32 %v84_v22, %v151_v24  ;;  %v163_v11 = vmax.f32 %v55_v21, %v122_v23 }
  0x8b   :  { %v87_v26 = vpop.f32.mrf.mxu1 }
  0x8f   :  { %v1626_v27 = vpop.f32.mrf.mxu2  ;;  %v154_v28 = vpop.f32.mrf.mxu3 }
  0x90   :  { %v1628_v29 = vpop.f32.mrf.mxu0  ;;  %v166_v7 = vmax.f32 %v87_v26, %v154_v28  ;;  %v165_v24 = vmax.f32 %v1624_v25, %v1626_v27 }
  0x93   :  { %v90_v30 = vpop.f32.mrf.mxu1 }
  0x97   :  { %v1630_v31 = vpop.f32.mrf.mxu2  ;;  %v157_v32 = vpop.f32.mrf.mxu3 }
  0x98   :  { %v167_v33 = vmax.f32 %v1628_v29, %v1630_v31  ;;  %v168_v34 = vmax.f32 %v90_v30, %v157_v32  ;;  %v1634_v35 = vpop.f32.mrf.mxu0 }
  0x9b   :  { %v1636_v36 = vpop.f32.mrf.mxu1 }
  0x9f   :  { %v1638_v37 = vpop.f32.mrf.mxu2  ;;  %v1640_v38 = vpop.f32.mrf.mxu3 }
  0xa0   :  { %v169_v39 = vmax.f32 %v1634_v35, %v1638_v37  ;;  %v170_v40 = vmax.f32 %v1636_v36, %v1640_v38  ;;  %v197_v41 = vpop.f32.mrf.mxu0 }
  0xa1   :  { %v238_v14 = vmax.f32 %v163_v11, %v197_v41 }
  0xa3   :  { %v226_v42 = vpop.f32.mrf.mxu1 }
  0xa4   :  { %v239_v4 = vmax.f32 %v164_v1, %v226_v42  ;;  %v623_v42 = vpop.permute.xlu0 %622 }
  0xa7   :  { %v272_v43 = vpop.f32.mrf.mxu2  ;;  %v301_v44 = vpop.f32.mrf.mxu3 }
  0xa8   :  { %v200_v45 = vpop.f32.mrf.mxu0  ;;  %v314_v8 = vmax.f32 %v239_v4, %v301_v44  ;;  %v313_v17 = vmax.f32 %v238_v14, %v272_v43  ;;  %v656_v44 = vld [vmem:[%s1862_s1 + $0x38] sm:$0xff]  ;;  %v655_v43 = vld [vmem:[%s1862_s1 + $0x30] sm:$0xff] }
  0xa9   :  { %v240_v23 = vmax.f32 %v165_v24, %v200_v45  ;;  %832 = vmatpush.msra.mxu0 %v656_v44  ;;  %1331 = vmatpush.msra.mxu1 %v656_v44 }
  0xaa   :  { %1333 = vmatpush.msra.mxu3 %v656_v44  ;;  %1332 = vmatpush.msra.mxu2 %v656_v44 }
  0xab   :  { %v229_v46 = vpop.f32.mrf.mxu1  ;;  %833 = vmatpush.msra.mxu0 %v655_v43  ;;  %1334 = vmatpush.msra.mxu1 %v655_v43 }
  0xac   :  { %v241_v12 = vmax.f32 %v166_v7, %v229_v46  ;;  %1336 = vmatpush.msra.mxu3 %v655_v43  ;;  %1335 = vmatpush.msra.mxu2 %v655_v43  ;;  %v627_v31 = vpop.permute.xlu0 %626 }
  0xaf   :  { %v1646_v47 = vpop.f32.mrf.mxu2  ;;  %v304_v48 = vpop.f32.mrf.mxu3 }
  0xb0   :  { %v1648_v49 = vpop.f32.mrf.mxu0  ;;  %v316_v18 = vmax.f32 %v241_v12, %v304_v48  ;;  %v315_v46 = vmax.f32 %v240_v23, %v1646_v47 }
  0xb1   :  { %v242_v11 = vmax.f32 %v167_v33, %v1648_v49 }
  0xb3   :  { %v232_v50 = vpop.f32.mrf.mxu1 }
  0xb4   :  { %v243_v26 = vmax.f32 %v168_v34, %v232_v50 }
  0xb7   :  { %v1650_v51 = vpop.f32.mrf.mxu2  ;;  %v1652_v52 = vpop.f32.mrf.mxu3 }
  0xb8   :  { %v1654_v53 = vpop.f32.mrf.mxu0  ;;  %v318_v25 = vmax.f32 %v243_v26, %v1652_v52  ;;  %v653_v52 = vld [vmem:[%s1862_s1 + $0x20] sm:$0xff]  ;;  %v317_v38 = vmax.f32 %v242_v11, %v1650_v51 }
  0xbb   :  { %v1656_v54 = vpop.f32.mrf.mxu1 }
  0xbf   :  { %v1658_v55 = vpop.f32.mrf.mxu2  ;;  %v1660_v56 = vpop.f32.mrf.mxu3 }
  0xc0   :  { %v347_v57 = vpop.f32.mrf.mxu0 }
  0xc1   :  { %v388_v22 = vmax.f32 %v313_v17, %v347_v57 }
  0xc3   :  { %v376_v58 = vpop.f32.mrf.mxu1 }
  0xc4   :  { %v389_v13 = vmax.f32 %v314_v8, %v376_v58  ;;  %v654_v58 = vld [vmem:[%s1862_s1 + $0x28] sm:$0xff] }
  0xc5   :  { %834 = vmatpush.msra.mxu0 %v654_v58  ;;  %1337 = vmatpush.msra.mxu1 %v654_v58 }
  0xc6   :  { %1339 = vmatpush.msra.mxu3 %v654_v58  ;;  %1338 = vmatpush.msra.mxu2 %v654_v58 }
  0xc7   :  { %v422_v59 = vpop.f32.mrf.mxu2  ;;  %v451_v60 = vpop.f32.mrf.mxu3  ;;  %835 = vmatpush.msra.mxu0 %v653_v52  ;;  %1340 = vmatpush.msra.mxu1 %v653_v52 }
  0xc8   :  { %v350_v61 = vpop.f32.mrf.mxu0  ;;  %v464_v19 = vmax.f32 %v389_v13, %v451_v60  ;;  %v463_v30 = vmax.f32 %v388_v22, %v422_v59  ;;  %1342 = vmatpush.msra.mxu3 %v653_v52  ;;  %1341 = vmatpush.msra.mxu2 %v653_v52 }
  0xc9   :  { %v390_v59 = vmax.f32 %v315_v46, %v350_v61 }
  0xcb   :  { %v379_v62 = vpop.f32.mrf.mxu1 }
  0xcc   :  { %v391_v32 = vmax.f32 %v316_v18, %v379_v62  ;;  %v245_v62 = vmax.f32 %v170_v40, %v1656_v54 }
  0xcf   :  { %v1662_v63 = vpop.f32.mrf.mxu2  ;;  %v454_v0 = vpop.f32.mrf.mxu3 }
  0xd0   :  { %v1664_v2 = vpop.f32.mrf.mxu0  ;;  %v466_v48 = vmax.f32 %v391_v32, %v454_v0  ;;  %v465_v0 = vmax.f32 %v390_v59, %v1662_v63  ;;  %v320_v63 = vmax.f32 %v245_v62, %v1660_v56  ;;  %v244_v56 = vmax.f32 %v169_v39, %v1654_v53 }
  0xd1   :  { %v392_v29 = vmax.f32 %v317_v38, %v1664_v2 }
  0xd3   :  { %v382_v3 = vpop.f32.mrf.mxu1 }
  0xd4   :  { %v393_v61 = vmax.f32 %v318_v25, %v382_v3 }
  0xd7   :  { %v1666_v5 = vpop.f32.mrf.mxu2  ;;  %v1668_v6 = vpop.f32.mrf.mxu3 }
  0xd8   :  { %v1670_v9 = vpop.f32.mrf.mxu0  ;;  %v468_v3 = vmax.f32 %v393_v61, %v1668_v6  ;;  %v467_v17 = vmax.f32 %v392_v29, %v1666_v5  ;;  %v631_v6 = vpop.permute.xlu1 %630  ;;  %v963_v61 = vld [vmem:[%s1862_s1 + $0x48] sm:$0x7] }
  0xd9   :  { %1325 = vmatpush.msk.msrb.mxu1 %vm980_vm3, %v963_v61 }
  0xdb   :  { %v1672_v10 = vpop.f32.mrf.mxu1 }
  0xdc   :  { %v395_v51 = vmax.f32 %v320_v63, %v1672_v10 }
  0xdf   :  { %v1674_v15 = vpop.f32.mrf.mxu2  ;;  %v1676_v16 = vpop.f32.mrf.mxu3 }
  0xe0   :  { %v497_v20 = vpop.f32.mrf.mxu0  ;;  %v470_v5 = vmax.f32 %v395_v51, %v1676_v16  ;;  %v635_v25 = vpop.permute.xlu1 %634 }
  0xe1   :  { %v538_v41 = vmax.f32 %v463_v30, %v497_v20 }
  0xe3   :  { %v526_v28 = vpop.f32.mrf.mxu1 }
  0xe4   :  { %v539_v21 = vmax.f32 %v464_v19, %v526_v28  ;;  %v319_v28 = vmax.f32 %v244_v56, %v1658_v55  ;;  %v971_v56 = vld [vmem:[%s1862_s1 + $0xb8] sm:$0xff] }
  0xe6   :  { %v394_v32 = vmax.f32 %v319_v28, %v1670_v9 }
  0xe7   :  { %v572_v27 = vpop.f32.mrf.mxu2  ;;  %v601_v34 = vpop.f32.mrf.mxu3 }
  0xe8   :  { %v613_v45 = vmax.f32 %v538_v41, %v572_v27  ;;  %v614_v50 = vmax.f32 %v539_v21, %v601_v34  ;;  %v500_v57 = vpop.f32.mrf.mxu0  ;;  %v469_v35 = vmax.f32 %v394_v32, %v1674_v15 }
  0xe9   :  { %v540_v36 = vmax.f32 %v465_v0, %v500_v57 }
  0xea   :  { %v638_v47 = vadd.f32 %v623_v42, %v614_v50  ;;  %v637_v60 = vadd.f32 %v623_v42, %v613_v45 }
  0xeb   :  { %v529_v1 = vpop.f32.mrf.mxu1 }
  0xec   :  { %v646_v4 = vmax.f32 %v638_v47, 0.0  ;;  %v541_v7 = vmax.f32 %v466_v48, %v529_v1  ;;  %v645_v8 = vmax.f32 %v637_v60, 0.0 }
  0xee   :  { %690 = vxpose.xlu0.b32.start [1/4] (short) %v646_v4, 128  ;;  %658 = vxpose.xlu2.b32.start [1/4] (short) %v645_v8, 128 }
  0xef   :  { %v575_v40 = vpop.f32.mrf.mxu2  ;;  %v604_v54 = vpop.f32.mrf.mxu3 }
  0xf0   :  { %v615_v12 = vmax.f32 %v540_v36, %v575_v40  ;;  %v616_v13 = vmax.f32 %v541_v7, %v604_v54  ;;  %v503_v33 = vpop.f32.mrf.mxu0 }
  0xf1   :  { %v542_v24 = vmax.f32 %v467_v17, %v503_v33 }
  0xf2   :  { %v640_v49 = vadd.f32 %v627_v31, %v616_v13  ;;  %v639_v14 = vadd.f32 %v627_v31, %v615_v12 }
  0xf3   :  { %v532_v18 = vpop.f32.mrf.mxu1 }
  0xf4   :  { %v648_v19 = vmax.f32 %v640_v49, 0.0  ;;  %v543_v20 = vmax.f32 %v468_v3, %v532_v18  ;;  %v647_v22 = vmax.f32 %v639_v14, 0.0 }
  0xf6   :  { %691 = vxpose.xlu0.b32.cont [2/4] (short) %v648_v19, 128  ;;  %659 = vxpose.xlu2.b32.cont [2/4] (short) %v647_v22, 128  ;;  %v970_v22 = vld [vmem:[%s1862_s1 + $0xb0] sm:$0xff] }
  0xf7   :  { %v578_v2 = vpop.f32.mrf.mxu2  ;;  %v607_v26 = vpop.f32.mrf.mxu3 }
  0xf8   :  { %v617_v30 = vmax.f32 %v542_v24, %v578_v2  ;;  %v618_v10 = vmax.f32 %v543_v20, %v607_v26  ;;  %v506_v42 = vpop.f32.mrf.mxu0 }
  0xf9   :  { %v544_v44 = vmax.f32 %v469_v35, %v506_v42 }
  0xfa   :  { %v642_v21 = vadd.f32 %v631_v6, %v618_v10  ;;  %v641_v23 = vadd.f32 %v631_v6, %v617_v30  ;;  %v1761_v10 = vld [vmem:[%s1862_s1 + $0x40] ss:$0 sm:$0xff] }
  0xfb   :  { %v535_v41 = vpop.f32.mrf.mxu1 }
  0xfc   :  { %v650_v37 = vmax.f32 %v642_v21, 0.0  ;;  %v545_v39 = vmax.f32 %v470_v5, %v535_v41  ;;  %v649_v53 = vmax.f32 %v641_v23, 0.0 }
  0xfe   :  { %692 = vxpose.xlu0.b32.cont [3/4] (short) %v650_v37, 128  ;;  %660 = vxpose.xlu2.b32.cont [3/4] (short) %v649_v53, 128 }
  0xff   :  { %v581_v43 = vpop.f32.mrf.mxu2  ;;  %v610_v55 = vpop.f32.mrf.mxu3 }
 0x100   :  { %v619_v46 = vmax.f32 %v544_v44, %v581_v43  ;;  %v620_v16 = vmax.f32 %v545_v39, %v610_v55 }
 0x102   :  { %v644_v27 = vadd.f32 %v635_v25, %v620_v16  ;;  %v643_v34 = vadd.f32 %v635_v25, %v619_v46 }
 0x104   :  { %v652_v9 = vmax.f32 %v644_v27, 0.0  ;;  %v651_v48 = vmax.f32 %v643_v34, 0.0 }
 0x106   :  { %693 = vxpose.xlu0.b32.end [4/4] (short) %v652_v9, 128  ;;  %661 = vxpose.xlu2.b32.end [4/4] (short) %v651_v48, 128 }
 0x187   :  { %v674_v45 = vpop.trf.xlu2 }
 0x188   :  { %1293 = vmatmul.msk.f32.vlgmr.msra.gmra.mxu0 %vm723_vm2, %v674_v45 }
 0x18f   :  { %v675_v15 = vpop.trf.xlu2 }
 0x190   :  { %1294 = vmatmul.msk.f32.gmra.mxu0 %vm723_vm2, %v675_v15 }
 0x192   :  { %v706_v50 = vpop.trf.xlu0 }
 0x197   :  { %v676_v57 = vpop.trf.xlu2 }
 0x198   :  { %1295 = vmatmul.msk.f32.gmra.mxu0 %vm723_vm2, %v676_v57 }
 0x19a   :  { %v707_v58 = vpop.trf.xlu0 }
 0x19f   :  { %v677_v59 = vpop.trf.xlu2 }
 0x1a0   :  { %1296 = vmatmul.msk.f32.gmra.mxu0 %vm723_vm2, %v677_v59 }
 0x1a2   :  { %v708_v47 = vpop.trf.xlu0 }
 0x1a3   :  { %1311 = vmatmul.msk.f32.vlgmr.msra.gmra.mxu2 %vm723_vm2, %v708_v47 }
 0x1a7   :  { %v678_v60 = vpop.trf.xlu2 }
 0x1a8   :  { %1297 = vmatmul.msk.f32.gmra.mxu0 %vm723_vm2, %v678_v60  ;;  %v968_v60 = vld [vmem:[%s1862_s1 + $0x68] sm:$0xff] }
 0x1a9   :  { %1044 = vmatpush.msrb.mxu2 %v968_v60 }
 0x1aa   :  { %v709_v52 = vpop.trf.xlu0 }
 0x1ab   :  { %1312 = vmatmul.msk.f32.gmra.mxu2 %vm723_vm2, %v709_v52 }
 0x1af   :  { %v679_v62 = vpop.trf.xlu2 }
 0x1b0   :  { %1298 = vmatmul.msk.f32.gmra.mxu0 %vm723_vm2, %v679_v62 }
 0x1b2   :  { %v710_v0 = vpop.trf.xlu0 }
 0x1b3   :  { %1313 = vmatmul.msk.f32.gmra.mxu2 %vm723_vm2, %v710_v0 }
 0x1b7   :  { %v680_v1 = vpop.trf.xlu2 }
 0x1b8   :  { %1299 = vmatmul.msk.f32.gmra.mxu0 %vm723_vm2, %v680_v1 }
 0x1ba   :  { %v711_v4 = vpop.trf.xlu0 }
 0x1bb   :  { %1314 = vmatmul.msk.f32.gmra.mxu2 %vm723_vm2, %v711_v4 }
 0x1bf   :  { %v681_v7 = vpop.trf.xlu2 }
 0x1c0   :  { %1300 = vmatmul.msk.f32.gmra.mxu0 %vm723_vm2, %v681_v7 }
 0x1c2   :  { %v712_v8 = vpop.trf.xlu0 }
 0x1c3   :  { %1315 = vmatmul.msk.f32.gmra.mxu2 %vm723_vm2, %v712_v8  ;;  %v967_v8 = vld [vmem:[%s1862_s1 + $0x60] sm:$0xff] }
 0x1c4   :  { %1045 = vmatpush.msrb.mxu2 %v967_v8 }
 0x1c7   :  { %v682_v11 = vpop.trf.xlu2 }
 0x1c8   :  { %1301 = vmatmul.msk.f32.gmra.mxu0 %vm723_vm2, %v682_v11 }
 0x1ca   :  { %v713_v36 = vpop.trf.xlu0 }
 0x1cb   :  { %1316 = vmatmul.msk.f32.vlgmr.msra.gmra.mxu3 %vm723_vm2, %v713_v36 }
 0x1cf   :  { %v683_v38 = vpop.trf.xlu2 }
 0x1d0   :  { %1302 = vmatmul.msk.f32.gmra.mxu0 %vm723_vm2, %v683_v38 }
 0x1d2   :  { %v714_v40 = vpop.trf.xlu0 }
 0x1d3   :  { %1317 = vmatmul.msk.f32.gmra.mxu3 %vm723_vm2, %v714_v40 }
 0x1d7   :  { %v684_v54 = vpop.trf.xlu2 }
 0x1d8   :  { %1303 = vmatmul.msk.f32.vlgmr.msra.gmra.mxu1 %vm723_vm2, %v684_v54 }
 0x1da   :  { %v715_v63 = vpop.trf.xlu0 }
 0x1db   :  { %1318 = vmatmul.msk.f32.gmra.mxu3 %vm723_vm2, %v715_v63 }
 0x1df   :  { %v685_v3 = vpop.trf.xlu2 }
 0x1e0   :  { %1304 = vmatmul.msk.f32.gmra.mxu1 %vm723_vm2, %v685_v3 }
 0x1e2   :  { %v716_v12 = vpop.trf.xlu0 }
 0x1e3   :  { %1319 = vmatmul.msk.f32.gmra.mxu3 %vm723_vm2, %v716_v12  ;;  %v966_v12 = vld [vmem:[%s1862_s1 + $0x58] sm:$0xff] }
 0x1e4   :  { %1046 = vmatpush.msrb.mxu2 %v966_v12  ;;  %v1350_v12 = vld [vmem:[%s1862_s1 + $0x42] ss:$0 sm:$0xff] }
 0x1e7   :  { %v686_v13 = vpop.trf.xlu2 }
 0x1e8   :  { %1305 = vmatmul.msk.f32.gmra.mxu1 %vm723_vm2, %v686_v13 }
 0x1ea   :  { %v717_v29 = vpop.trf.xlu0 }
 0x1eb   :  { %1320 = vmatmul.msk.f32.gmra.mxu3 %vm723_vm2, %v717_v29  ;;  %v965_v29 = vld [vmem:[%s1862_s1 + $0x50] sm:$0xff] }
 0x1ec   :  { %1047 = vmatpush.msrb.mxu2 %v965_v29 }
 0x1ef   :  { %v687_v31 = vpop.trf.xlu2 }
 0x1f0   :  { %1306 = vmatmul.msk.f32.gmra.mxu1 %vm723_vm2, %v687_v31 }
 0x1f2   :  { %v718_v33 = vpop.trf.xlu0 }
 0x1f3   :  { %1321 = vmatmul.msk.f32.gmra.mxu3 %vm723_vm2, %v718_v33 }
 0x1f7   :  { %v688_v49 = vpop.trf.xlu2 }
 0x1f8   :  { %1307 = vmatmul.msk.f32.gmra.mxu1 %vm723_vm2, %v688_v49  ;;  %v1349_v49 = vld [vmem:[%s1862_s1 + $0x41] ss:$0 sm:$0xff] }
 0x1fa   :  { %v719_v14 = vpop.trf.xlu0 }
 0x1fb   :  { %1322 = vmatmul.msk.f32.gmra.mxu3 %vm723_vm2, %v719_v14 }
 0x1ff   :  { %v689_v17 = vpop.trf.xlu2 }
 0x200   :  { %1308 = vmatmul.msk.f32.gmra.mxu1 %vm723_vm2, %v689_v17 }
 0x202   :  { %v720_v18 = vpop.trf.xlu0 }
 0x203   :  { %1323 = vmatmul.msk.f32.gmra.mxu3 %vm723_vm2, %v720_v18 }
 0x205   :  { %v837_v19 = vpop.f32.mrf.mxu0 }
 0x206   :  { %v838_v23 = vadd.f32 %v1761_v10, %v837_v19 }
 0x208   :  { %1309 = vmatmul.msk.f32.gmra.mxu1 %vm723_vm2, %v706_v50 }
 0x20a   :  { %v721_v51 = vpop.trf.xlu0 }
 0x20b   :  { %1324 = vmatmul.msk.f32.gmra.mxu3 %vm723_vm2, %v721_v51 }
 0x20d   :  { %v840_v20 = vpop.f32.mrf.mxu0 }
 0x20e   :  { %v841_v46 = vadd.f32 %v1761_v10, %v840_v20 }
 0x210   :  { %1310 = vmatmul.msk.f32.gmra.mxu1 %vm723_vm2, %v707_v58 }
 0x215   :  { %v843_v6 = vpop.f32.mrf.mxu0 }
 0x216   :  { %v844_v32 = vadd.f32 %v1761_v10, %v843_v6 }
 0x218   :  { %1326 = vmatmul.msk.f32.vlgmr.msrb.gmra.mxu1 %vm973_vm4, %v970_v22  ;;  %v933_v35 = vmax.f32 %v838_v23, %v844_v32 }
 0x21d   :  { %v846_v24 = vpop.f32.mrf.mxu0 }
 0x21e   :  { %v847_v44 = vadd.f32 %v1761_v10, %v846_v24 }
 0x220   :  { %1327 = vmatmul.msk.f32.gmra.mxu1 %vm973_vm4, %v971_v56  ;;  %v934_v9 = vmax.f32 %v841_v46, %v847_v44 }
 0x225   :  { %v849_v2 = vpop.f32.mrf.mxu0 }
 0x226   :  { %v850_v42 = vadd.f32 %v1761_v10, %v849_v2  ;;  %v891_v44 = vpop.f32.mrf.mxu2 }
 0x228   :  { %v935_v39 = vmax.f32 %v933_v35, %v850_v42 }
 0x22d   :  { %v852_v26 = vpop.f32.mrf.mxu0 }
 0x22e   :  { %v853_v16 = vadd.f32 %v1761_v10, %v852_v26 }
 0x230   :  { %v936_v50 = vmax.f32 %v934_v9, %v853_v16  ;;  %v892_v9 = vadd.f32 %v1761_v10, %v891_v44 }
 0x235   :  { %v855_v28 = vpop.f32.mrf.mxu0 }
 0x236   :  { %v856_v37 = vadd.f32 %v1761_v10, %v855_v28 }
 0x238   :  { %v937_v43 = vmax.f32 %v935_v39, %v856_v37 }
 0x23d   :  { %v858_v5 = vpop.f32.mrf.mxu0 }
 0x23e   :  { %v859_v48 = vadd.f32 %v1761_v10, %v858_v5 }
 0x240   :  { %v938_v59 = vmax.f32 %v936_v50, %v859_v48 }
 0x245   :  { %v861_v21 = vpop.f32.mrf.mxu0 }
 0x246   :  { %v862_v53 = vadd.f32 %v1761_v10, %v861_v21 }
 0x248   :  { %v939_v25 = vmax.f32 %v937_v43, %v862_v53 }
 0x24d   :  { %v864_v27 = vpop.f32.mrf.mxu0 }
 0x24e   :  { %v865_v57 = vadd.f32 %v1761_v10, %v864_v27  ;;  %v906_v39 = vpop.f32.mrf.mxu3 }
 0x250   :  { %v940_v52 = vmax.f32 %v938_v59, %v865_v57 }
 0x255   :  { %v867_v30 = vpop.f32.mrf.mxu1 }
 0x256   :  { %v868_v55 = vadd.f32 %v1761_v10, %v867_v30  ;;  %v909_v53 = vpop.f32.mrf.mxu3 }
 0x258   :  { %v941_v45 = vmax.f32 %v939_v25, %v868_v55  ;;  %v894_v55 = vpop.f32.mrf.mxu2 }
 0x259   :  { %v895_v50 = vadd.f32 %v1761_v10, %v894_v55 }
 0x25d   :  { %v870_v41 = vpop.f32.mrf.mxu1 }
 0x25e   :  { %v871_v47 = vadd.f32 %v1761_v10, %v870_v41  ;;  %v912_v43 = vpop.f32.mrf.mxu3 }
 0x25f   :  { %v913_v8 = vadd.f32 %v1761_v10, %v912_v43 }
 0x260   :  { %v942_v0 = vmax.f32 %v940_v52, %v871_v47  ;;  %v897_v16 = vpop.f32.mrf.mxu2  ;;  %v910_v47 = vadd.f32 %v1761_v10, %v909_v53 }
 0x261   :  { %v898_v48 = vadd.f32 %v1761_v10, %v897_v16 }
 0x265   :  { %v873_v34 = vpop.f32.mrf.mxu1 }
 0x266   :  { %v874_v15 = vadd.f32 %v1761_v10, %v873_v34  ;;  %v915_v46 = vpop.f32.mrf.mxu3 }
 0x268   :  { %v943_v58 = vmax.f32 %v941_v45, %v874_v15  ;;  %v900_v27 = vpop.f32.mrf.mxu2 }
 0x269   :  { %v901_v60 = vadd.f32 %v1761_v10, %v900_v27 }
 0x26d   :  { %v876_v62 = vpop.f32.mrf.mxu1 }
 0x26e   :  { %v877_v1 = vadd.f32 %v1761_v10, %v876_v62  ;;  %v918_v25 = vpop.f32.mrf.mxu3 }
 0x270   :  { %v944_v61 = vmax.f32 %v942_v0, %v877_v1  ;;  %v903_v15 = vpop.f32.mrf.mxu2  ;;  %v907_v0 = vadd.f32 %v1761_v10, %v906_v39  ;;  %v916_v1 = vadd.f32 %v1761_v10, %v915_v46 }
 0x271   :  { %v904_v57 = vadd.f32 %v1761_v10, %v903_v15 }
 0x275   :  { %v879_v4 = vpop.f32.mrf.mxu1 }
 0x276   :  { %v880_v7 = vadd.f32 %v1761_v10, %v879_v4  ;;  %v921_v34 = vpop.f32.mrf.mxu3 }
 0x278   :  { %v945_v11 = vmax.f32 %v943_v58, %v880_v7 }
 0x27d   :  { %v882_v36 = vpop.f32.mrf.mxu1 }
 0x27e   :  { %v883_v38 = vadd.f32 %v1761_v10, %v882_v36  ;;  %v924_v59 = vpop.f32.mrf.mxu3 }
 0x27f   :  { %v925_v29 = vadd.f32 %v1761_v10, %v924_v59 }
 0x280   :  { %v946_v40 = vmax.f32 %v944_v61, %v883_v38 }
 0x285   :  { %v885_v54 = vpop.f32.mrf.mxu1 }
 0x286   :  { %v886_v63 = vadd.f32 %v1761_v10, %v885_v54  ;;  %v927_v7 = vpop.f32.mrf.mxu3 }
 0x287   :  { %v928_v54 = vadd.f32 %v1761_v10, %v927_v7  ;;  %v1148_v7 = vld [vmem:[%s1862_s1 + $0x80] sm:$0xff] }
 0x288   :  { %v947_v3 = vmax.f32 %v945_v11, %v886_v63  ;;  %v922_v11 = vadd.f32 %v1761_v10, %v921_v34 }
 0x28a   :  { %v949_v45 = vmax.f32 %v947_v3, %v892_v9 }
 0x28c   :  { %v951_v58 = vmax.f32 %v949_v45, %v898_v48 }
 0x28d   :  { %v888_v13 = vpop.f32.mrf.mxu1 }
 0x28e   :  { %v889_v31 = vadd.f32 %v1761_v10, %v888_v13  ;;  %v953_v52 = vmax.f32 %v951_v58, %v904_v57  ;;  %v1153_v57 = vld [vmem:[%s1862_s1 + $0xa8] sm:$0xff]  ;;  %v1152_v58 = vld [vmem:[%s1862_s1 + $0xa0] sm:$0xff] }
 0x28f   :  { %1170 = vmatpush.msrb.mxu3 %v1153_v57 }
 0x290   :  { %v948_v33 = vmax.f32 %v946_v40, %v889_v31  ;;  %v955_v61 = vmax.f32 %v953_v52, %v910_v47  ;;  %v919_v40 = vadd.f32 %v1761_v10, %v918_v25  ;;  %v1151_v52 = vld [vmem:[%s1862_s1 + $0x98] sm:$0xff] }
 0x291   :  { %1171 = vmatpush.msrb.mxu3 %v1152_v58 }
 0x292   :  { %v950_v62 = vmax.f32 %v948_v33, %v895_v50  ;;  %v957_v38 = vmax.f32 %v955_v61, %v916_v1  ;;  %v1150_v1 = vld [vmem:[%s1862_s1 + $0x90] sm:$0xff]  ;;  %v1149_v61 = vld [vmem:[%s1862_s1 + $0x88] sm:$0xff] }
 0x293   :  { %1172 = vmatpush.msrb.mxu3 %v1151_v52 }
 0x294   :  { %v952_v4 = vmax.f32 %v950_v62, %v901_v60  ;;  %v959_v63 = vmax.f32 %v957_v38, %v922_v11  ;;  %v1147_v11 = vld [vmem:[%s1862_s1 + $0x78] sm:$0xff] }
 0x295   :  { %v1001_v14 = vpop.f32.mrf.mxu1  ;;  %1173 = vmatpush.msrb.mxu3 %v1150_v1 }
 0x296   :  { %v1002_v17 = vadd.f32 %v1349_v49, %v1001_v14  ;;  %v954_v36 = vmax.f32 %v952_v4, %v907_v0  ;;  %v961_v31 = vmax.f32 %v959_v63, %v928_v54  ;;  %v1351_v14 = vld [vmem:[%s1862_s1 + $0x44] ss:$0 sm:$0xff] }
 0x297   :  { %1174 = vmatpush.msrb.mxu3 %v1149_v61 }
 0x298   :  { %v1007_v18 = vmul.f32 %v1002_v17, %v1002_v17  ;;  %v956_v3 = vmax.f32 %v954_v36, %v913_v8 }
 0x299   :  { %1175 = vmatpush.msrb.mxu3 %v1148_v7 }
 0x29a   :  { %v1009_v51 = vmul.f32 %v1007_v18, %v1002_v17  ;;  %v958_v33 = vmax.f32 %v956_v3, %v919_v40  ;;  %v1146_v40 = vld [vmem:[%s1862_s1 + $0x70] sm:$0xff] }
 0x29b   :  { %1176 = vmatpush.msrb.mxu3 %v1147_v11 }
 0x29c   :  { %v1011_v19 = vmul.f32 0.044715, %v1009_v51 }
 0x29d   :  { %v1004_v20 = vpop.f32.mrf.mxu1  ;;  %1177 = vmatpush.msrb.mxu3 %v1146_v40 }
 0x29e   :  { %v1013_v22 = vadd.f32 %v1011_v19, %v1002_v17  ;;  %v1005_v56 = vadd.f32 %v1349_v49, %v1004_v20  ;;  %v960_v19 = vmax.f32 %v958_v33, %v925_v29 }
 0x2a0   :  { %v1015_v6 = vmul.f32 0.7978846, %v1013_v22  ;;  %v1008_v24 = vmul.f32 %v1005_v56, %v1005_v56 }
 0x2a2   :  { %1353 = vtanh.f32 %v1015_v6  ;;  %v1010_v2 = vmul.f32 %v1008_v24, %v1005_v56 }
 0x2a4   :  { %v1012_v26 = vmul.f32 0.044715, %v1010_v2 }
 0x2a6   :  { %v1014_v28 = vadd.f32 %v1012_v26, %v1005_v56 }
 0x2a8   :  { %v1354_v5 = vpop.eup %1353  ;;  %v1016_v30 = vmul.f32 0.7978846, %v1014_v28 }
 0x2a9   :  { %v1019_v32 = vadd.f32 1.0, %v1354_v5 }
 0x2aa   :  { %1355 = vtanh.f32 %v1016_v30 }
 0x2ab   :  { %v1021_v21 = vmul.f32 0.5, %v1019_v32 }
 0x2ad   :  { %v1023_v23 = vmul.f32 %v1021_v21, %v1002_v17  ;;  %v930_v17 = vpop.f32.mrf.mxu3 }
 0x2ae   :  { %v931_v51 = vadd.f32 %v1761_v10, %v930_v17 }
 0x2af   :  { %1328 = vmatmul.msk.f32.vlgmr.msrb.gmra.mxu2 %vm723_vm2, %v1023_v23 }
 0x2b0   :  { %v1356_v42 = vpop.eup %1355  ;;  %v962_v6 = vmax.f32 %v960_v19, %v931_v51 }
 0x2b1   :  { %v1020_v41 = vadd.f32 1.0, %v1356_v42 }
 0x2b3   :  { %v1022_v35 = vmul.f32 0.5, %v1020_v41 }
 0x2b5   :  { %v1024_v37 = vmul.f32 %v1022_v35, %v1005_v56 }
 0x2b7   :  { %1329 = vmatmul.msk.f32.gmra.mxu2 %vm723_vm2, %v1024_v37 }
 0x332   :  { %v1049_v13 = vpop.f32.mrf.mxu2 }
 0x333   :  { %v1050_v49 = vadd.f32 %v1350_v12, %v1049_v13 }
 0x335   :  { %v1817_v18 = vadd.f32 %v1050_v49, %v961_v31 }
 0x337   :  { %v1059_v20 = vmul.f32 %v1351_v14, %v1817_v18 }
 0x339   :  { %v1062_v22 = vsel %vm1061_vm5, %v1059_v20, 0.0 }
 0x33a   :  { %v1052_v56 = vpop.f32.mrf.mxu2  ;;  %1063 = vadd.xlane.f32.xlu1 %v1062_v22 }
 0x33b   :  { %v1053_v24 = vadd.f32 %v1350_v12, %v1052_v56 }
 0x33d   :  { %v1822_v2 = vadd.f32 %v1053_v24, %v962_v6 }
 0x33f   :  { %v1060_v26 = vmul.f32 %v1351_v14, %v1822_v2 }
 0x341   :  { %v1065_v28 = vsel %vm1061_vm5, %v1060_v26, 0.0 }
 0x342   :  { %1066 = vadd.xlane.f32.xlu2 %v1065_v28 }
 0x3ad   :  { %v1064_v5 = vpop.xlane.xlu1 %1063 }
 0x3ae   :  { %v1068_v30 = vmul.f32 0.125, %v1064_v5 }
 0x3b0   :  { %v1070_v32 = vrot.slane %v1068_v30, 4 }
 0x3b2   :  { %v1071_v10 = vmax.f32 %v1068_v30, %v1070_v32 }
 0x3b4   :  { %v1072_v21 = vrot.slane %v1071_v10, 2 }
 0x3b5   :  { %v1067_v23 = vpop.xlane.xlu2 %1066 }
 0x3b6   :  { %v1073_v42 = vmax.f32 %v1071_v10, %v1072_v21  ;;  %v1069_v41 = vmul.f32 0.125, %v1067_v23 }
 0x3b8   :  { %v1074_v35 = vrot.slane %v1073_v42, 1  ;;  %v1076_v37 = vrot.slane %v1069_v41, 4 }
 0x3ba   :  { %v1075_v39 = vmax.f32 %v1073_v42, %v1074_v35  ;;  %v1077_v53 = vmax.f32 %v1069_v41, %v1076_v37 }
 0x3bc   :  { %v1082_v44 = vsub.f32 %v1068_v30, %v1075_v39  ;;  %v1078_v43 = vrot.slane %v1077_v53, 2 }
 0x3be   :  { %v1084_v55 = vmul.f32 1.442695, %v1082_v44  ;;  %v1079_v46 = vmax.f32 %v1077_v53, %v1078_v43 }
 0x3c0   :  { %1357 = vpow2.f32 %v1084_v55  ;;  %v1080_v16 = vrot.slane %v1079_v46, 1 }
 0x3c2   :  { %v1081_v25 = vmax.f32 %v1079_v46, %v1080_v16 }
 0x3c4   :  { %v1083_v27 = vsub.f32 %v1069_v41, %v1081_v25 }
 0x3c6   :  { %v1358_v34 = vpop.eup %1357  ;;  %v1086_v9 = vmul.f32 1.442695, %v1083_v27 }
 0x3c7   :  { %v1088_v48 = vrot.slane %v1358_v34, 4 }
 0x3c8   :  { %1359 = vpow2.f32 %v1086_v9 }
 0x3c9   :  { %v1089_v45 = vadd.f32 %v1358_v34, %v1088_v48 }
 0x3cb   :  { %v1090_v15 = vrot.slane %v1089_v45, 2 }
 0x3cd   :  { %v1091_v50 = vadd.f32 %v1090_v15, %v1089_v45 }
 0x3ce   :  { %v1360_v59 = vpop.eup %1359 }
 0x3cf   :  { %v1092_v47 = vrot.slane %v1091_v50, 1  ;;  %v1094_v60 = vrot.slane %v1360_v59, 4 }
 0x3d1   :  { %v1093_v62 = vadd.f32 %v1092_v47, %v1091_v50  ;;  %v1095_v0 = vadd.f32 %v1360_v59, %v1094_v60 }
 0x3d3   :  { %1361 = vrcp.f32 %v1093_v62  ;;  %v1096_v4 = vrot.slane %v1095_v0, 2  ;;  %v1111_v12 = vand.u32 2147483648, %v1093_v62  ;;  %v1109_v29 = vand.u32 2147483647, %v1093_v62 }
 0x3d4   :  { %vm1105_vm7 = vweird.f32 %v1093_v62 }
 0x3d5   :  { %v1097_v8 = vadd.f32 %v1096_v4, %v1095_v0  ;;  %v1112_v33 = vor.u32 1.1754944e-38, %v1111_v12  ;;  %vm1110_vm9 = vcmp.eq.f32.partialorder %v1109_v29, 8.507059e+37 }
 0x3d7   :  { %v1098_v36 = vrot.slane %v1097_v8, 1 }
 0x3d9   :  { %v1362_v38 = vpop.eup %1361  ;;  %v1099_v63 = vadd.f32 %v1098_v36, %v1097_v8 }
 0x3da   :  { %v1101_v54 = vmul.f32 %v1362_v38, %v1093_v62  ;;  %vm1106_vm6 = vweird.f32 %v1362_v38 }
 0x3db   :  { %1363 = vrcp.f32 %v1099_v63  ;;  %vm1107_vm8 = vmor %vm1105_vm7, %vm1106_vm6  ;;  %v1126_v22 = vand.u32 2147483648, %v1099_v63  ;;  %v1124_v24 = vand.u32 2147483647, %v1099_v63  ;;  %vm1120_vm11 = vweird.f32 %v1099_v63 }
 0x3dc   :  { %v1102_v3 = vsub.f32 1.0, %v1101_v54 }
 0x3dd   :  { %v1127_v30 = vor.u32 1.1754944e-38, %v1126_v22  ;;  %vm1125_vm13 = vcmp.eq.f32.partialorder %v1124_v24, 8.507059e+37 }
 0x3de   :  { %v1103_v13 = vmul.f32 %v1362_v38, %v1102_v3 }
 0x3e0   :  { %v1104_v31 = vadd.f32 %v1362_v38, %v1103_v13 }
 0x3e1   :  { %v1364_v49 = vpop.eup %1363 }
 0x3e2   :  { %v1108_v14 = vsel %vm1107_vm8, %v1362_v38, %v1104_v31  ;;  %v1116_v51 = vmul.f32 %v1364_v49, %v1099_v63  ;;  %vm1121_vm10 = vweird.f32 %v1364_v49 }
 0x3e3   :  { %v1113_v17 = vsel %vm1110_vm9, %v1112_v33, %v1108_v14  ;;  %vm1122_vm12 = vmor %vm1120_vm11, %vm1121_vm10 }
 0x3e4   :  { %v1114_v19 = vmul.f32 %v1358_v34, %v1113_v17  ;;  %v1117_v20 = vsub.f32 1.0, %v1116_v51 }
 0x3e6   :  { %v1130_v56 = vmul.f32 %v1114_v19, %v1817_v18  ;;  %v1118_v6 = vmul.f32 %v1364_v49, %v1117_v20 }
 0x3e8   :  { %v1132_v26 = vsel %vm1061_vm5, %v1130_v56, 0.0  ;;  %v1119_v28 = vadd.f32 %v1364_v49, %v1118_v6 }
 0x3e9   :  { %v1133_v5 = vrot.slane %v1132_v26, 4 }
 0x3ea   :  { %v1123_v32 = vsel %vm1122_vm12, %v1364_v49, %v1119_v28 }
 0x3eb   :  { %v1128_v10 = vsel %vm1125_vm13, %v1127_v30, %v1123_v32  ;;  %v1134_v21 = vadd.f32 %v1133_v5, %v1132_v26 }
 0x3ec   :  { %v1129_v23 = vmul.f32 %v1360_v59, %v1128_v10 }
 0x3ed   :  { %v1135_v41 = vrot.slane %v1134_v21, 2 }
 0x3ee   :  { %v1131_v42 = vmul.f32 %v1129_v23, %v1822_v2  ;;  %v1352_v2 = vld [vmem:[%s1862_s1 + $0x43] ss:$0 sm:$0xff] }
 0x3ef   :  { %v1136_v37 = vadd.f32 %v1135_v41, %v1134_v21 }
 0x3f0   :  { %v1139_v18 = vsel %vm1061_vm5, %v1131_v42, 0.0 }
 0x3f1   :  { %v1140_v35 = vrot.slane %v1139_v18, 4  ;;  %v1137_v44 = vrot.slane %v1136_v37, 1 }
 0x3f3   :  { %v1141_v39 = vadd.f32 %v1140_v35, %v1139_v18  ;;  %v1138_v46 = vadd.f32 %v1137_v44, %v1136_v37 }
 0x3f5   :  { %v1142_v53 = vrot.slane %v1141_v39, 2 }
 0x3f7   :  { %v1143_v43 = vadd.f32 %v1142_v53, %v1141_v39 }
 0x3f9   :  { %v1144_v55 = vrot.slane %v1143_v43, 1 }
 0x3fb   :  { %v1145_v16 = vadd.f32 %v1144_v55, %v1143_v43 }
 0x3fd   :  { %v1159_v25 = vsel %vm1158_vm14, %v1145_v16, %v1138_v46 }
 0x3fe   :  { %1330 = vmatmul.msk.f32.vlgmr.msrb.gmra.mxu3 %vm1061_vm5, %v1159_v25 }
 0x481   :  { %v1179_v27 = vpop.f32.mrf.mxu3 }
 0x482   :  { %v1180_v34 = vadd.f32 %v1352_v2, %v1179_v27 }
 0x484   :  { %1182 = vst [vmem:[#allocation2] sm:$0x3] %v1180_v34 }
 0x485   :  { %1193 = dma.vmem_to_hbm [thread:$0]  %s1189_s12, 32, %s1191_s15, [#allocation3]  }
 0x486   :  { %1389 = dma.done.wait [#allocation3], 32  }
 0x487   :  { %1390 = vsyncadd [#allocation3], 4294967264 }
 0x488   :  { %1198 = vsyncpa [#allocation3], 1 }

</bundles_post_ra>
